<compile_context>
chip_gen: v7x
topology: tpu7x:2x2x1
jax: 0.10.0
libtpu: 0.0.40
codegen_flags: <defaults>
</compile_context>

<pallas_src>
import functools

import jax
import jax.numpy as jnp
from jax import lax
from jax.experimental import pallas as pl
from jax.experimental.pallas import tpu as pltpu

EPS = 1e-5  # nn.LayerNorm default


def _round_up(x, m):
    return (x + m - 1) // m * m


def _choose_block_m(M, cap):
    """Row-tile size: (a) whole M if it fits; else (b) largest multiple-of-8 divisor of M <= cap
    (no padding, no post-kernel slice pass); else (c) fall back to padding M up to a multiple of
    cap."""
    cap = max(8, cap - cap % 8)
    if M <= cap:
        return M, M
    for bm in range(cap, 7, -8):
        if M % bm == 0:
            return bm, M
    return cap, _round_up(M, cap)


# ------------------------------------------------------------------ Pallas kernel
def patch_embed_kernel(xp_ref, w_ref, b_ref, g_ref, beta_ref, o_ref, *, use_norm, inv_e):
    # xp_ref: (bm, K) flattened patches   w_ref: (K, E_pad)   b/g/beta: (1, E_pad)
    # o_ref: (bm, E_pad)  -- E_pad is a multiple of 128 so the stores are lane-dense.
    x = xp_ref[...]
    w = w_ref[...]
    y = jnp.dot(x, w, preferred_element_type=jnp.float32) + b_ref[...]
    if use_norm:
        # Single-pass LayerNorm over the true embedding dim. Padded lanes of y are exactly 0
        # (zero-padded weights + bias), so sums are unchanged; divide by the true E via inv_e.
        s1 = jnp.sum(y, axis=-1, keepdims=True)
        s2 = jnp.sum(y * y, axis=-1, keepdims=True)
        mu = s1 * inv_e
        var = jnp.maximum(s2 * inv_e - mu * mu, 0.0)
        # gamma/beta are zero in the padded lanes, so padded output lanes stay exactly 0.
        y = (y - mu) * lax.rsqrt(var + EPS) * g_ref[...] + beta_ref[...]
    o_ref[...] = y.astype(o_ref.dtype)


# ------------------------------------------------------------------ wrapper
def patch_embed(x, conv_w, conv_b, gamma=None, beta=None, *, patch_size,
                block_m=4096, vmem_budget_bytes=14 << 20, min_grid_steps=1,
                out_dtype=None, return_padded=False):
    """x: (B, in_chans, L); conv_w: (embed_dim, in_chans, P); conv_b: (embed_dim,).

    min_grid_steps: set to 2 on v7x (2 TensorCores / chip) so both cores get work; leave at 1
                    on single-TC v5e/v6e.
    out_dtype:      set jnp.bfloat16 when the consumer takes bf16 (kernel is output-write bound).
    return_padded:  return the lane-dense (B, NP, E_pad) output (padded lanes are exactly 0) so
                    downstream code can avoid the extra HBM pass of slicing back to E.
    """
    B, C_in, L = x.shape
    assert L % patch_size == 0, "img_size must be divisible by patch_size"
    E, C_w, P = conv_w.shape
    assert C_w == C_in and P == patch_size
    NP = L // patch_size
    K = C_in * patch_size
    M = B * NP
    out_dtype = out_dtype or x.dtype
    use_norm = gamma is not None

    # Lane-dense output width (96 -> 128): unmasked full-lane stores on the dominant tensor.
    E_pad = max(128, _round_up(E, 128))

    # patchify: (B, C_in, L) -> (B*NP, C_in*P), (c, k)-fast ordering matches Conv1d weights.
    xp = x.reshape(B, C_in, NP, patch_size).transpose(0, 2, 1, 3).reshape(M, K)

    pad_e = E_pad - E
    w2 = jnp.pad(conv_w.reshape(E, K).T.astype(jnp.float32), ((0, 0), (0, pad_e)))     # (K, E_pad)
    b2 = jnp.pad(conv_b.astype(jnp.float32), (0, pad_e)).reshape(1, E_pad)
    g_src = gamma if use_norm else jnp.ones((E,), jnp.float32)
    be_src = beta if use_norm else jnp.zeros((E,), jnp.float32)
    g2 = jnp.pad(g_src.astype(jnp.float32), (0, pad_e)).reshape(1, E_pad)
    be2 = jnp.pad(be_src.astype(jnp.float32), (0, pad_e)).reshape(1, E_pad)

    # --- row tiling: budget VMEM with the *lane-padded* tile footprint (the (bm, K) input tile
    # occupies (bm, max(K,128)) lanes in VMEM even for K=4), double-buffered in + out.
    in_lane = max(128, _round_up(K, 128))
    in_bytes = jnp.dtype(x.dtype).itemsize
    ob = jnp.dtype(out_dtype).itemsize
    bytes_per_row = 2 * (in_lane * in_bytes + E_pad * ob)
    resident = (_round_up(K, 8) * E_pad + 3 * E_pad) * 4 + (1 << 16)   # weight + params + slack
    cap = min(block_m, max(8, (vmem_budget_bytes - resident) // bytes_per_row))
    if min_grid_steps > 1:  # only useful on multi-TC parts (v7x): keep a balanced >=2-step grid
        cap = min(cap, max(8, _round_up(pl.cdiv(M, min_grid_steps), 8)))
    bm, M_pad = _choose_block_m(M, cap)
    if M_pad != M:  # rare fallback; divisor choice above normally avoids this entirely
        xp = jnp.pad(xp, ((0, M_pad - M), (0, 0)))
    grid = (M_pad // bm,)

    kernel = functools.partial(patch_embed_kernel, use_norm=use_norm, inv_e=1.0 / E)
    out = pl.pallas_call(
        kernel,
        out_shape=jax.ShapeDtypeStruct((M_pad, E_pad), out_dtype),
        grid_spec=pltpu.PrefetchScalarGridSpec(
            num_scalar_prefetch=0,
            grid=grid,
            in_specs=[
                pl.BlockSpec((bm, K), lambda i: (i, 0)),       # patch rows (tiled over the grid)
                pl.BlockSpec((K, E_pad), lambda i: (0, 0)),    # projection weight, resident
                pl.BlockSpec((1, E_pad), lambda i: (0, 0)),    # conv bias (zero-padded lanes)
                pl.BlockSpec((1, E_pad), lambda i: (0, 0)),    # LN gamma  (zero-padded lanes)
                pl.BlockSpec((1, E_pad), lambda i: (0, 0)),    # LN beta   (zero-padded lanes)
            ],
            out_specs=pl.BlockSpec((bm, E_pad), lambda i: (i, 0)),
        ),
        compiler_params=pltpu.CompilerParams(dimension_semantics=("parallel",)),
    )(xp, w2, b2, g2, be2)

    out = out[:M].reshape(B, NP, E_pad)
    if return_padded:
        return out            # lane-dense; columns >= E are exactly 0
    # TODO(synk): this slice is one extra pass over the output; consumers that can deal with a
    #             128-wide (zero-padded) embedding should call with return_padded=True instead.
    return out[..., :E]


# ------------------------------------------------------------------ pure-JAX reference (mirrors torch forward)
def ref_forward(x, conv_w, conv_b, gamma=None, beta=None, *, patch_size):
    out = lax.conv_general_dilated(
        x.astype(jnp.float32), conv_w.astype(jnp.float32),
        window_strides=(patch_size,), padding="VALID",
        dimension_numbers=("NCH", "OIH", "NCH"))                  # (B, E, NP)
    out = out + conv_b.reshape(1, -1, 1)
    out = jnp.transpose(out, (0, 2, 1))                           # (B, NP, E)  == .transpose(1, 2)
    if gamma is not None:
        mu = jnp.mean(out, axis=-1, keepdims=True)
        var = jnp.mean((out - mu) ** 2, axis=-1, keepdims=True)
        out = (out - mu) * lax.rsqrt(var + EPS) * gamma + beta
    return out


# ------------------------------------------------------------------ main
if __name__ == "__main__":
    B, C_in, L = 2, 1, 512          # small shapes consistent with PatchEmbed (in_chans=1)
    P, E = 4, 96                    # patch_size, embed_dim

    key = jax.random.PRNGKey(0)
    k_x, k_w, k_b, k_g, k_be, k_x2, k_w2 = jax.random.split(key, 7)
    x = jax.random.normal(k_x, (B, C_in, L), jnp.float32)
    conv_w = 0.1 * jax.random.normal(k_w, (E, C_in, P), jnp.float32)
    conv_b = 0.1 * jax.random.normal(k_b, (E,), jnp.float32)
    gamma = 1.0 + 0.1 * jax.random.normal(k_g, (E,), jnp.float32)
    beta = 0.1 * jax.random.normal(k_be, (E,), jnp.float32)

    # --- norm_layer = LayerNorm path (fused single-pass norm), default tiling ---
    out = jax.block_until_ready(patch_embed(x, conv_w, conv_b, gamma, beta, patch_size=P))
    ref = ref_forward(x, conv_w, conv_b, gamma, beta, patch_size=P)
    assert out.shape == (B, L // P, E)
    err = float(jnp.max(jnp.abs(out - ref)))
    assert jnp.allclose(out, ref, atol=1e-4, rtol=1e-4), f"max abs err {err}"

    # --- norm_layer = None path, in_chans > 1 (checks (c,k) patchify ordering); also exercises
    #     the v7x-style min_grid_steps=2 split and the lane-dense return_padded path.
    C2 = 3
    x2 = jax.random.normal(k_x2, (B, C2, L), jnp.float32)
    conv_w2 = 0.1 * jax.random.normal(k_w2, (E, C2, P), jnp.float32)
    out2 = jax.block_until_ready(
        patch_embed(x2, conv_w2, conv_b, patch_size=P, min_grid_steps=2, return_padded=True))
    assert out2.shape == (B, L // P, 128)
    ref2 = ref_forward(x2, conv_w2, conv_b, patch_size=P)
    err2 = float(jnp.max(jnp.abs(out2[..., :E] - ref2)))
    assert jnp.allclose(out2[..., :E], ref2, atol=1e-4, rtol=1e-4), f"max abs err {err2}"
    assert float(jnp.max(jnp.abs(out2[..., E:]))) == 0.0   # padded lanes are exactly zero

    print("KERNEL_OK")
</pallas_src>

<mosaic_0001>
module attributes {stable_mosaic.version = 11 : i64} {
  func.func @patch_embed_kernel(%arg0: i32, %arg1: memref<256x4xf32, #tpu.memory_space<vmem>>, %arg2: memref<4x128xf32, #tpu.memory_space<vmem>>, %arg3: memref<1x128xf32, #tpu.memory_space<vmem>>, %arg4: memref<1x128xf32, #tpu.memory_space<vmem>>, %arg5: memref<1x128xf32, #tpu.memory_space<vmem>>, %arg6: memref<256x128xf32, #tpu.memory_space<vmem>>) attributes {dimension_semantics = [#tpu.dimension_semantics<parallel>], iteration_bounds = array<i64: 1>, scalar_prefetch = 0 : i64, scratch_operands = 0 : i64, tpu.core_type = #tpu.core_type<tc>, window_params = [{transform_indices = @transform_0, window_bounds = array<i64: 256, 4>}, {pipeline_mode = #tpu.pipeline_mode<synchronous>, transform_indices = @transform_1, window_bounds = array<i64: 4, 128>}, {pipeline_mode = #tpu.pipeline_mode<synchronous>, transform_indices = @transform_2, window_bounds = array<i64: 1, 128>}, {pipeline_mode = #tpu.pipeline_mode<synchronous>, transform_indices = @transform_3, window_bounds = array<i64: 1, 128>}, {pipeline_mode = #tpu.pipeline_mode<synchronous>, transform_indices = @transform_4, window_bounds = array<i64: 1, 128>}, {transform_indices = @transform_5, window_bounds = array<i64: 256, 128>}]} {
    %c0 = arith.constant 0 : index
    %c0_0 = arith.constant 0 : index
    %0 = vector.load %arg1[%c0, %c0_0] : memref<256x4xf32, #tpu.memory_space<vmem>>, vector<256x4xf32>
    %c0_1 = arith.constant 0 : index
    %c0_2 = arith.constant 0 : index
    %1 = vector.load %arg2[%c0_1, %c0_2] : memref<4x128xf32, #tpu.memory_space<vmem>>, vector<4x128xf32>
    %cst = arith.constant dense<0.000000e+00> : vector<256x128xf32>
    %2 = tpu.matmul %0, %1, %cst {dimension_numbers = #tpu.dot_dimension_numbers<[1], [0], [0], [1], [0, 0, 1, 1], [], []>} : vector<256x4xf32>, vector<4x128xf32>, vector<256x128xf32> -> vector<256x128xf32>
    %c0_3 = arith.constant 0 : index
    %c0_4 = arith.constant 0 : index
    %3 = vector.load %arg3[%c0_3, %c0_4] : memref<1x128xf32, #tpu.memory_space<vmem>>, vector<1x128xf32>
    %4 = vector.broadcast %3 : vector<1x128xf32> to vector<256x128xf32>
    %5 = arith.addf %2, %4 : vector<256x128xf32>
    %cst_5 = arith.constant dense<0.000000e+00> : vector<256xf32>
    %6 = vector.multi_reduction <add>, %5, %cst_5 [1] : vector<256x128xf32> to vector<256xf32>
    %7 = vector.shape_cast %6 : vector<256xf32> to vector<256x1xf32>
    %8 = arith.mulf %5, %5 : vector<256x128xf32>
    %cst_6 = arith.constant dense<0.000000e+00> : vector<256xf32>
    %9 = vector.multi_reduction <add>, %8, %cst_6 [1] : vector<256x128xf32> to vector<256xf32>
    %10 = vector.shape_cast %9 : vector<256xf32> to vector<256x1xf32>
    %cst_7 = arith.constant 0.010416667 : f32
    %11 = vector.broadcast %cst_7 : f32 to vector<256x1xf32>
    %12 = arith.mulf %7, %11 : vector<256x1xf32>
    %cst_8 = arith.constant 0.010416667 : f32
    %13 = vector.broadcast %cst_8 : f32 to vector<256x1xf32>
    %14 = arith.mulf %10, %13 : vector<256x1xf32>
    %15 = arith.mulf %12, %12 : vector<256x1xf32>
    %16 = arith.subf %14, %15 : vector<256x1xf32>
    %cst_9 = arith.constant 0.000000e+00 : f32
    %17 = vector.broadcast %cst_9 : f32 to vector<256x1xf32>
    %18 = arith.maximumf %16, %17 : vector<256x1xf32>
    %19 = vector.broadcast %12 : vector<256x1xf32> to vector<256x128xf32>
    %20 = arith.subf %5, %19 : vector<256x128xf32>
    %cst_10 = arith.constant 9.99999974E-6 : f32
    %21 = vector.broadcast %cst_10 : f32 to vector<256x1xf32>
    %22 = arith.addf %18, %21 : vector<256x1xf32>
    %23 = math.rsqrt %22 : vector<256x1xf32>
    %24 = vector.broadcast %23 : vector<256x1xf32> to vector<256x128xf32>
    %25 = arith.mulf %20, %24 : vector<256x128xf32>
    %c0_11 = arith.constant 0 : index
    %c0_12 = arith.constant 0 : index
    %26 = vector.load %arg4[%c0_11, %c0_12] : memref<1x128xf32, #tpu.memory_space<vmem>>, vector<1x128xf32>
    %27 = vector.broadcast %26 : vector<1x128xf32> to vector<256x128xf32>
    %28 = arith.mulf %25, %27 : vector<256x128xf32>
    %c0_13 = arith.constant 0 : index
    %c0_14 = arith.constant 0 : index
    %29 = vector.load %arg5[%c0_13, %c0_14] : memref<1x128xf32, #tpu.memory_space<vmem>>, vector<1x128xf32>
    %30 = vector.broadcast %29 : vector<1x128xf32> to vector<256x128xf32>
    %31 = arith.addf %28, %30 : vector<256x128xf32>
    %c0_15 = arith.constant 0 : index
    %c0_16 = arith.constant 0 : index
    %32 = vector.load %arg6[%c0_15, %c0_16] : memref<256x128xf32, #tpu.memory_space<vmem>>, vector<256x128xf32>
    tpu.vector_store %arg6[%c0_15, %c0_16], %31 {strides = array<i32>} : memref<256x128xf32, #tpu.memory_space<vmem>>, vector<256x128xf32>,
    return
  }
  func.func @transform_0(%arg0: i32) -> (i32, i32) {
    %c0_i32 = arith.constant 0 : i32
    %c0_i32_0 = arith.constant 0 : i32
    return %arg0, %c0_i32 : i32, i32
  }
  func.func @transform_1(%arg0: i32) -> (i32, i32) {
    %c0_i32 = arith.constant 0 : i32
    %c0_i32_0 = arith.constant 0 : i32
    %c0_i32_1 = arith.constant 0 : i32
    return %c0_i32, %c0_i32_0 : i32, i32
  }
  func.func @transform_2(%arg0: i32) -> (i32, i32) {
    %c0_i32 = arith.constant 0 : i32
    %c0_i32_0 = arith.constant 0 : i32
    %c0_i32_1 = arith.constant 0 : i32
    return %c0_i32, %c0_i32_0 : i32, i32
  }
  func.func @transform_3(%arg0: i32) -> (i32, i32) {
    %c0_i32 = arith.constant 0 : i32
    %c0_i32_0 = arith.constant 0 : i32
    %c0_i32_1 = arith.constant 0 : i32
    return %c0_i32, %c0_i32_0 : i32, i32
  }
  func.func @transform_4(%arg0: i32) -> (i32, i32) {
    %c0_i32 = arith.constant 0 : i32
    %c0_i32_0 = arith.constant 0 : i32
    %c0_i32_1 = arith.constant 0 : i32
    return %c0_i32, %c0_i32_0 : i32, i32
  }
  func.func @transform_5(%arg0: i32) -> (i32, i32) {
    %c0_i32 = arith.constant 0 : i32
    %c0_i32_0 = arith.constant 0 : i32
    return %arg0, %c0_i32 : i32, i32
  }
}

</mosaic_0001>

<bundles_post_ra>
// kernel: tpu_custom_call.1
= control target key start
LH: loop header
LB: loop body
LE: loop exit
PB: predicated region body
PF: predicated region fallthrough
CT: control target
= control target key end

     0   :  { %vm158_vm0 = vcmask 1043456   ;;  %vm61_vm1 = vcmask 31744   ;;  %s1812_s0 = inlined_call_operand.vmem [shape: f32[256,4], index: 0, kind: input, shape index: {}]   ;;  %s1813_s1 = inlined_call_operand.vmem [shape: f32[4,128], index: 1, kind: input, shape index: {}]   ;;  %s1814_s2 = inlined_call_operand.vmem [shape: f32[1,128], index: 2, kind: input, shape index: {}]   ;;  %s1815_s3 = inlined_call_operand.vmem [shape: f32[1,128], index: 3, kind: input, shape index: {}]   ;;  %s1816_s4 = inlined_call_operand.vmem [shape: f32[1,128], index: 4, kind: input, shape index: {}]   ;;  %s1817_s5 = inlined_call_operand.hbm [shape: f32[256,128], index: 5, kind: output, shape index: {}]  }
   0x1   :  { %v53_v0 = vld [vmem:[%s1813_s1] sm:$0xf]  ;;  %v22_v3 = vld [vmem:[%s1812_s0 + $0x8] sm:$0xff]  ;;  %v23_v5 = vld [vmem:[%s1812_s0 + $0x10] sm:$0xff] }
   0x2   :  { %v21_v1 = vld [vmem:[%s1812_s0] sm:$0xff]  ;;  %1030 = vmatprep.subr.msk.mxu0 %vm158_vm0, %v53_v0  ;;  %1080 = vmatprep.subr.msk.mxu1 %vm158_vm0, %v53_v0  ;;  %v38_v4 = vld [vmem:[%s1812_s0 + $0x88] sm:$0xff]  ;;  %v39_v6 = vld [vmem:[%s1812_s0 + $0x90] sm:$0xff] }
   0x3   :  { %v37_v2 = vld [vmem:[%s1812_s0 + $0x80] sm:$0xff]  ;;  %1031 = vmatpush3.msk.msra.mxu0 %vm158_vm0, %v53_v0  ;;  %1081 = vmatpush3.msk.msra.mxu1 %vm158_vm0, %v53_v0  ;;  %v24_v7 = vld [vmem:[%s1812_s0 + $0x18] sm:$0xff]  ;;  %v26_v11 = vld [vmem:[%s1812_s0 + $0x28] sm:$0xff] }
   0x4   :  { %1032 = vmatprep.mubr.msk.f32.mxu0 %vm61_vm1, %v21_v1  ;;  %1056 = vmatprep.mubr.msk.f32.mxu1 %vm61_vm1, %v37_v2  ;;  %v40_v8 = vld [vmem:[%s1812_s0 + $0x98] sm:$0xff]  ;;  %v25_v9 = vld [vmem:[%s1812_s0 + $0x20] sm:$0xff]  ;;  %v42_v12 = vld [vmem:[%s1812_s0 + $0xa8] sm:$0xff] }
   0x5   :  { %1033 = vmatmul.mubr.msk.f32.vlgmr.msra.gmra.mrb[0].mxu0 %vm61_vm1, %v22_v3  ;;  %1057 = vmatmul.mubr.msk.f32.vlgmr.msra.gmra.mrb[0].mxu1 %vm61_vm1, %v38_v4  ;;  %v41_v10 = vld [vmem:[%s1812_s0 + $0xa0] sm:$0xff]  ;;  %v27_v13 = vld [vmem:[%s1812_s0 + $0x30] sm:$0xff] }
   0x6   :  { %1035 = vmatprep.mubr.msk.f32.mxu0 %vm61_vm1, %v23_v5  ;;  %1059 = vmatprep.mubr.msk.f32.mxu1 %vm61_vm1, %v39_v6  ;;  %v43_v14 = vld [vmem:[%s1812_s0 + $0xb0] sm:$0xff] }
   0x9   :  { %1036 = vmatmul.mubr.msk.f32.gmra.mrb[2].mxu0 %vm61_vm1, %v24_v7  ;;  %1060 = vmatmul.mubr.msk.f32.gmra.mrb[2].mxu1 %vm61_vm1, %v40_v8 }
   0xa   :  { %1038 = vmatprep.mubr.msk.f32.mxu0 %vm61_vm1, %v25_v9  ;;  %1062 = vmatprep.mubr.msk.f32.mxu1 %vm61_vm1, %v41_v10 }
   0xb   :  { %10 = vsyncpa [#allocation3], 0  ;;  %v28_v15 = vld [vmem:[%s1812_s0 + $0x38] sm:$0xff]  ;;  %v29_v17 = vld [vmem:[%s1812_s0 + $0x40] sm:$0xff] }
   0xc   :  { %v44_v16 = vld [vmem:[%s1812_s0 + $0xb8] sm:$0xff]  ;;  %v45_v18 = vld [vmem:[%s1812_s0 + $0xc0] sm:$0xff]  ;;  %v30_v19 = vld [vmem:[%s1812_s0 + $0x48] sm:$0xff] }
   0xd   :  { %1039 = vmatmul.mubr.msk.f32.gmra.mrb[4].mxu0 %vm61_vm1, %v26_v11  ;;  %1063 = vmatmul.mubr.msk.f32.gmra.mrb[4].mxu1 %vm61_vm1, %v42_v12  ;;  %v46_v20 = vld [vmem:[%s1812_s0 + $0xc8] sm:$0xff]  ;;  %v31_v21 = vld [vmem:[%s1812_s0 + $0x50] sm:$0xff]  ;;  %v32_v23 = vld [vmem:[%s1812_s0 + $0x58] sm:$0xff] }
   0xe   :  { %1041 = vmatprep.mubr.msk.f32.mxu0 %vm61_vm1, %v27_v13  ;;  %1065 = vmatprep.mubr.msk.f32.mxu1 %vm61_vm1, %v43_v14  ;;  %v47_v22 = vld [vmem:[%s1812_s0 + $0xd0] sm:$0xff]  ;;  %v48_v24 = vld [vmem:[%s1812_s0 + $0xd8] sm:$0xff]  ;;  %v33_v25 = vld [vmem:[%s1812_s0 + $0x60] sm:$0xff] }
   0xf   :  { %v49_v26 = vld [vmem:[%s1812_s0 + $0xe0] sm:$0xff]  ;;  %v34_v27 = vld [vmem:[%s1812_s0 + $0x68] sm:$0xff]  ;;  %v35_v29 = vld [vmem:[%s1812_s0 + $0x70] sm:$0xff] }
  0x10   :  { %v50_v28 = vld [vmem:[%s1812_s0 + $0xe8] sm:$0xff]  ;;  %v51_v30 = vld [vmem:[%s1812_s0 + $0xf0] sm:$0xff]  ;;  %v36_v31 = vld [vmem:[%s1812_s0 + $0x78] sm:$0xff] }
  0x11   :  { %1042 = vmatmul.mubr.msk.f32.gmra.mrb[6].mxu0 %vm61_vm1, %v28_v15  ;;  %1066 = vmatmul.mubr.msk.f32.gmra.mrb[6].mxu1 %vm61_vm1, %v44_v16  ;;  %v52_v32 = vld [vmem:[%s1812_s0 + $0xf8] sm:$0xff]  ;;  %v1340_v33 = vld [vmem:[%s1814_s2] ss:$0 sm:$0xff] }
  0x12   :  { %1044 = vmatprep.mubr.msk.f32.mxu0 %vm61_vm1, %v29_v17  ;;  %1068 = vmatprep.mubr.msk.f32.mxu1 %vm61_vm1, %v45_v18 }
  0x15   :  { %1045 = vmatmul.mubr.msk.f32.gmra.mrb[8].mxu0 %vm61_vm1, %v30_v19  ;;  %1069 = vmatmul.mubr.msk.f32.gmra.mrb[8].mxu1 %vm61_vm1, %v46_v20 }
  0x16   :  { %1047 = vmatprep.mubr.msk.f32.mxu0 %vm61_vm1, %v31_v21  ;;  %1071 = vmatprep.mubr.msk.f32.mxu1 %vm61_vm1, %v47_v22 }
  0x19   :  { %1048 = vmatmul.mubr.msk.f32.gmra.mrb[10].mxu0 %vm61_vm1, %v32_v23  ;;  %1072 = vmatmul.mubr.msk.f32.gmra.mrb[10].mxu1 %vm61_vm1, %v48_v24 }
  0x1a   :  { %1050 = vmatprep.mubr.msk.f32.mxu0 %vm61_vm1, %v33_v25  ;;  %1074 = vmatprep.mubr.msk.f32.mxu1 %vm61_vm1, %v49_v26 }
  0x1d   :  { %1051 = vmatmul.mubr.msk.f32.gmra.mrb[12].mxu0 %vm61_vm1, %v34_v27  ;;  %1075 = vmatmul.mubr.msk.f32.gmra.mrb[12].mxu1 %vm61_vm1, %v50_v28 }
  0x1e   :  { %1053 = vmatprep.mubr.msk.f32.mxu0 %vm61_vm1, %v35_v29  ;;  %1077 = vmatprep.mubr.msk.f32.mxu1 %vm61_vm1, %v51_v30 }
  0x21   :  { %1054 = vmatmul.mubr.msk.f32.gmra.mrb[14].mxu0 %vm61_vm1, %v36_v31  ;;  %1078 = vmatmul.mubr.msk.f32.gmra.mrb[14].mxu1 %vm61_vm1, %v52_v32 }
  0xd8   :  { %v1034_v34 = vpop.f32.mrb[0].mxu0  ;;  %v1058_v35 = vpop.f32.mrb[0].mxu1 }
  0xd9   :  { %v1343_v36 = vadd.f32 %v1034_v34, %v1340_v33  ;;  %v1346_v37 = vadd.f32 %v1058_v35, %v1340_v33  ;;  %v228_v38 = vpop.f32.mrb[1].mxu0  ;;  %v308_v39 = vpop.f32.mrb[1].mxu1 }
  0xda   :  { %v1351_v42 = vadd.f32 %v1340_v33, %v228_v38  ;;  %v1359_v48 = vadd.f32 %v1340_v33, %v308_v39 }
  0xdb   :  { %421 = vadd.xlane.f32.xlu1 %v1346_v37  ;;  %389 = vadd.xlane.f32.xlu0 %v1343_v36  ;;  %v452_v43 = vmul.f32 %v1343_v36, %v1343_v36  ;;  %v468_v49 = vmul.f32 %v1346_v37, %v1346_v37 }
  0xdc   :  { %v1037_v40 = vpop.f32.mrb[2].mxu0  ;;  %v1061_v41 = vpop.f32.mrb[2].mxu1  ;;  %v451_v55 = vmul.f32 %v1351_v42, %v1351_v42  ;;  %v467_v61 = vmul.f32 %v1359_v48, %v1359_v48 }
  0xdd   :  { %v238_v44 = vpop.f32.mrb[3].mxu0  ;;  %v318_v45 = vpop.f32.mrb[3].mxu1  ;;  %v1364_v52 = vadd.f32 %v1037_v40, %v1340_v33  ;;  %v1378_v58 = vadd.f32 %v1061_v41, %v1340_v33 }
  0xde   :  { %v1397_v6 = vadd.f32 %v1340_v33, %v238_v44  ;;  %v1400_v7 = vadd.f32 %v1340_v33, %v318_v45 }
  0xdf   :  { %485 = vadd.xlane.f32.xlu1 %v452_v43  ;;  %387 = vadd.xlane.f32.xlu0 %v1351_v42  ;;  %v454_v16 = vmul.f32 %v1364_v52, %v1364_v52  ;;  %v470_v26 = vmul.f32 %v1378_v58, %v1378_v58 }
  0xe0   :  { %v1040_v46 = vpop.f32.mrb[4].mxu0  ;;  %v1356_v47 = vpop.f32.mrb[4].mxu1  ;;  %v453_v17 = vmul.f32 %v1397_v6, %v1397_v6  ;;  %v469_v27 = vmul.f32 %v1400_v7, %v1400_v7 }
  0xe1   :  { %v248_v50 = vpop.f32.mrb[5].mxu0  ;;  %v328_v51 = vpop.f32.mrb[5].mxu1  ;;  %v1449_v35 = vadd.f32 %v1040_v46, %v1340_v33  ;;  %v1456_v39 = vadd.f32 %v1356_v47, %v1340_v33 }
  0xe2   :  { %v1452_v38 = vadd.f32 %v1340_v33, %v248_v50  ;;  %v1459_v40 = vadd.f32 %v1340_v33, %v328_v51 }
  0xe3   :  { %517 = vadd.xlane.f32.xlu1 %v468_v49  ;;  %419 = vadd.xlane.f32.xlu0 %v1359_v48  ;;  %v456_v41 = vmul.f32 %v1449_v35, %v1449_v35  ;;  %v472_v44 = vmul.f32 %v1456_v39, %v1456_v39 }
  0xe4   :  { %v1367_v53 = vpop.f32.mrb[6].mxu0  ;;  %v1369_v54 = vpop.f32.mrb[6].mxu1  ;;  %v455_v43 = vmul.f32 %v1452_v38, %v1452_v38  ;;  %v471_v45 = vmul.f32 %v1459_v40, %v1459_v40 }
  0xe5   :  { %v1373_v56 = vpop.f32.mrb[7].mxu0  ;;  %v1375_v57 = vpop.f32.mrb[7].mxu1  ;;  %v1475_v46 = vadd.f32 %v1367_v53, %v1340_v33  ;;  %v1483_v49 = vadd.f32 %v1369_v54, %v1340_v33 }
  0xe6   :  { %v1479_v47 = vadd.f32 %v1340_v33, %v1373_v56  ;;  %v1487_v50 = vadd.f32 %v1340_v33, %v1375_v57 }
  0xe7   :  { %393 = vadd.xlane.f32.xlu1 %v1364_v52  ;;  %483 = vadd.xlane.f32.xlu0 %v451_v55  ;;  %v458_v51 = vmul.f32 %v1475_v46, %v1475_v46 }
  0xe8   :  { %v1046_v59 = vpop.f32.mrb[8].mxu0  ;;  %v1070_v60 = vpop.f32.mrb[8].mxu1  ;;  %v457_v53 = vmul.f32 %v1479_v47, %v1479_v47  ;;  %v473_v54 = vmul.f32 %v1487_v50, %v1487_v50 }
  0xe9   :  { %v1384_v62 = vadd.f32 %v1046_v59, %v1340_v33  ;;  %v268_v63 = vpop.f32.mrb[9].mxu0  ;;  %v1387_v0 = vadd.f32 %v1070_v60, %v1340_v33  ;;  %v348_v1 = vpop.f32.mrb[9].mxu1 }
  0xea   :  { %v1390_v2 = vadd.f32 %v1340_v33, %v268_v63  ;;  %v1393_v3 = vadd.f32 %v1340_v33, %v348_v1 }
  0xeb   :  { %425 = vadd.xlane.f32.xlu1 %v1378_v58  ;;  %515 = vadd.xlane.f32.xlu0 %v467_v61  ;;  %v460_v55 = vmul.f32 %v1384_v62, %v1384_v62  ;;  %v476_v57 = vmul.f32 %v1387_v0, %v1387_v0 }
  0xec   :  { %v1049_v4 = vpop.f32.mrb[10].mxu0  ;;  %v1073_v5 = vpop.f32.mrb[10].mxu1  ;;  %v459_v56 = vmul.f32 %v1390_v2, %v1390_v2  ;;  %v475_v59 = vmul.f32 %v1393_v3, %v1393_v3 }
  0xed   :  { %v1403_v8 = vadd.f32 %v1049_v4, %v1340_v33  ;;  %v278_v9 = vpop.f32.mrb[11].mxu0  ;;  %v1406_v10 = vadd.f32 %v1073_v5, %v1340_v33  ;;  %v358_v11 = vpop.f32.mrb[11].mxu1 }
  0xee   :  { %v1409_v12 = vadd.f32 %v1340_v33, %v278_v9  ;;  %v1412_v13 = vadd.f32 %v1340_v33, %v358_v11 }
  0xef   :  { %391 = vadd.xlane.f32.xlu1 %v1397_v6  ;;  %423 = vadd.xlane.f32.xlu0 %v1400_v7  ;;  %v462_v60 = vmul.f32 %v1403_v8, %v1403_v8  ;;  %v478_v63 = vmul.f32 %v1406_v10, %v1406_v10 }
  0xf0   :  { %v1052_v14 = vpop.f32.mrb[12].mxu0  ;;  %v1076_v15 = vpop.f32.mrb[12].mxu1  ;;  %v461_v61 = vmul.f32 %v1409_v12, %v1409_v12  ;;  %v477_v1 = vmul.f32 %v1412_v13, %v1412_v13 }
  0xf1   :  { %v1421_v18 = vadd.f32 %v1052_v14, %v1340_v33  ;;  %v288_v19 = vpop.f32.mrb[13].mxu0  ;;  %v1424_v20 = vadd.f32 %v1076_v15, %v1340_v33  ;;  %v368_v21 = vpop.f32.mrb[13].mxu1 }
  0xf2   :  { %v1427_v22 = vadd.f32 %v1340_v33, %v288_v19  ;;  %v1430_v23 = vadd.f32 %v1340_v33, %v368_v21 }
  0xf3   :  { %489 = vadd.xlane.f32.xlu1 %v454_v16  ;;  %487 = vadd.xlane.f32.xlu0 %v453_v17  ;;  %v464_v4 = vmul.f32 %v1421_v18, %v1421_v18  ;;  %v480_v9 = vmul.f32 %v1424_v20, %v1424_v20 }
  0xf4   :  { %v1055_v24 = vpop.f32.mrb[14].mxu0  ;;  %v1079_v25 = vpop.f32.mrb[14].mxu1  ;;  %v463_v5 = vmul.f32 %v1427_v22, %v1427_v22  ;;  %v479_v11 = vmul.f32 %v1430_v23, %v1430_v23 }
  0xf5   :  { %v1437_v28 = vadd.f32 %v1055_v24, %v1340_v33  ;;  %v298_v29 = vpop.f32.mrb[15].mxu0  ;;  %v1440_v30 = vadd.f32 %v1079_v25, %v1340_v33  ;;  %v378_v31 = vpop.f32.mrb[15].mxu1 }
  0xf6   :  { %v1443_v32 = vadd.f32 %v1340_v33, %v298_v29  ;;  %v1446_v34 = vadd.f32 %v1340_v33, %v378_v31  ;;  %v474_v33 = vmul.f32 %v1483_v49, %v1483_v49 }
  0xf7   :  { %521 = vadd.xlane.f32.xlu1 %v470_v26  ;;  %519 = vadd.xlane.f32.xlu0 %v469_v27  ;;  %v466_v14 = vmul.f32 %v1437_v28, %v1437_v28  ;;  %v482_v16 = vmul.f32 %v1440_v30, %v1440_v30 }
  0xf8   :  { %v465_v15 = vmul.f32 %v1443_v32, %v1443_v32  ;;  %v481_v17 = vmul.f32 %v1446_v34, %v1446_v34 }
  0xfb   :  { %397 = vadd.xlane.f32.xlu1 %v1449_v35  ;;  %395 = vadd.xlane.f32.xlu0 %v1452_v38 }
  0xff   :  { %429 = vadd.xlane.f32.xlu1 %v1456_v39  ;;  %427 = vadd.xlane.f32.xlu0 %v1459_v40 }
 0x103   :  { %493 = vadd.xlane.f32.xlu1 %v456_v41  ;;  %491 = vadd.xlane.f32.xlu0 %v455_v43 }
 0x107   :  { %525 = vadd.xlane.f32.xlu1 %v472_v44  ;;  %523 = vadd.xlane.f32.xlu0 %v471_v45 }
 0x10b   :  { %401 = vadd.xlane.f32.xlu1 %v1475_v46  ;;  %399 = vadd.xlane.f32.xlu0 %v1479_v47 }
 0x10f   :  { %433 = vadd.xlane.f32.xlu1 %v1483_v49  ;;  %431 = vadd.xlane.f32.xlu0 %v1487_v50 }
 0x113   :  { %497 = vadd.xlane.f32.xlu1 %v458_v51  ;;  %495 = vadd.xlane.f32.xlu0 %v457_v53 }
 0x117   :  { %529 = vadd.xlane.f32.xlu1 %v474_v33  ;;  %527 = vadd.xlane.f32.xlu0 %v473_v54 }
 0x11b   :  { %405 = vadd.xlane.f32.xlu1 %v1384_v62  ;;  %403 = vadd.xlane.f32.xlu0 %v1390_v2 }
 0x11f   :  { %437 = vadd.xlane.f32.xlu1 %v1387_v0  ;;  %435 = vadd.xlane.f32.xlu0 %v1393_v3 }
 0x123   :  { %501 = vadd.xlane.f32.xlu1 %v460_v55  ;;  %499 = vadd.xlane.f32.xlu0 %v459_v56 }
 0x127   :  { %533 = vadd.xlane.f32.xlu1 %v476_v57  ;;  %531 = vadd.xlane.f32.xlu0 %v475_v59 }
 0x12b   :  { %409 = vadd.xlane.f32.xlu1 %v1403_v8  ;;  %407 = vadd.xlane.f32.xlu0 %v1409_v12 }
 0x12f   :  { %441 = vadd.xlane.f32.xlu1 %v1406_v10  ;;  %439 = vadd.xlane.f32.xlu0 %v1412_v13 }
 0x133   :  { %505 = vadd.xlane.f32.xlu1 %v462_v60  ;;  %503 = vadd.xlane.f32.xlu0 %v461_v61 }
 0x137   :  { %537 = vadd.xlane.f32.xlu1 %v478_v63  ;;  %535 = vadd.xlane.f32.xlu0 %v477_v1 }
 0x13b   :  { %413 = vadd.xlane.f32.xlu1 %v1421_v18  ;;  %411 = vadd.xlane.f32.xlu0 %v1427_v22 }
 0x13f   :  { %445 = vadd.xlane.f32.xlu1 %v1424_v20  ;;  %443 = vadd.xlane.f32.xlu0 %v1430_v23 }
 0x143   :  { %509 = vadd.xlane.f32.xlu1 %v464_v4  ;;  %507 = vadd.xlane.f32.xlu0 %v463_v5 }
 0x147   :  { %541 = vadd.xlane.f32.xlu1 %v480_v9  ;;  %539 = vadd.xlane.f32.xlu0 %v479_v11 }
 0x14b   :  { %417 = vadd.xlane.f32.xlu1 %v1437_v28  ;;  %415 = vadd.xlane.f32.xlu0 %v1443_v32 }
 0x14f   :  { %449 = vadd.xlane.f32.xlu1 %v1440_v30  ;;  %447 = vadd.xlane.f32.xlu0 %v1446_v34 }
 0x153   :  { %513 = vadd.xlane.f32.xlu1 %v466_v14  ;;  %511 = vadd.xlane.f32.xlu0 %v465_v15 }
 0x157   :  { %545 = vadd.xlane.f32.xlu1 %v482_v16  ;;  %543 = vadd.xlane.f32.xlu0 %v481_v17 }
 0x168   :  { %v422_v19 = vpop.xlane.xlu1 %421  ;;  %v390_v21 = vpop.xlane.xlu0 %389 }
 0x169   :  { %v548_v24 = vmul.f32 0.010416667, %v390_v21  ;;  %v564_v27 = vmul.f32 0.010416667, %v422_v19 }
 0x16b   :  { %v612_v29 = vmul.f32 %v548_v24, %v548_v24  ;;  %v628_v51 = vmul.f32 %v564_v27, %v564_v27 }
 0x16c   :  { %v486_v25 = vpop.xlane.xlu1 %485  ;;  %v388_v26 = vpop.xlane.xlu0 %387 }
 0x16d   :  { %v580_v31 = vmul.f32 0.010416667, %v486_v25  ;;  %v1549_v43 = vmul.f32 0.010416667, %v388_v26 }
 0x16f   :  { %v644_v41 = vsub.f32 %v580_v31, %v612_v29  ;;  %v611_v56 = vmul.f32 %v1549_v43, %v1549_v43  ;;  %v708_v31 = vsub.f32 %v1343_v36, %v548_v24  ;;  %v1576_v36 = vld [vmem:[%s1816_s4] ss:$0 sm:$0xff] }
 0x170   :  { %v518_v44 = vpop.xlane.xlu1 %517  ;;  %v420_v45 = vpop.xlane.xlu0 %419 }
 0x171   :  { %v676_v53 = vmax.f32 %v644_v41, 0.0  ;;  %v596_v33 = vmul.f32 0.010416667, %v518_v44  ;;  %v1553_v61 = vmul.f32 0.010416667, %v420_v45 }
 0x172   :  { %v1565_v44 = vld [vmem:[%s1815_s3] ss:$0 sm:$0xff]  ;;  %s1173_s3 = smov [#allocation2]  }
 0x173   :  { %v740_v54 = vadd.f32 1e-05, %v676_v53  ;;  %v660_v55 = vsub.f32 %v596_v33, %v628_v51  ;;  %v627_v11 = vmul.f32 %v1553_v61, %v1553_v61  ;;  %s950_s4 = sshll.u32 %s1173_s3, 4  ;;  %s951_s4 = int_to_ptr.vmem [resolvable:$true] %s950_s4 }
 0x174   :  { %v394_v57 = vpop.xlane.xlu1 %393  ;;  %v484_v59 = vpop.xlane.xlu0 %483  ;;  %s1149_s10 = scalar_lea.vmem %s951_s4, 4096  ;;  %p1154_p1 = scmp.lt.s32.totalorder %s951_s4, %s951_s4 }
 0x175   :  { %1085 = vrsqrt.f32 %v740_v54  ;;  %v692_v60 = vmax.f32 %v660_v55, 0.0  ;;  %v579_v63 = vmul.f32 0.010416667, %v484_v59  ;;  %v1557_v19 = vmul.f32 0.010416667, %v394_v57  ;;  %p1150_p0 = scmp.ne.s32.totalorder %s951_s4, %s1149_s10  ;;  %p1155_p2 = scmp.lt.s32.totalorder %s1149_s10, %s1149_s10 }
 0x177   :  { %v756_v1 = vadd.f32 1e-05, %v692_v60  ;;  %v643_v4 = vsub.f32 %v579_v63, %v611_v56  ;;  %v614_v53 = vmul.f32 %v1557_v19, %v1557_v19  ;;  %v724_v60 = vsub.f32 %v1346_v37, %v564_v27  ;;  %p1156_p3 = por %p1155_p2, %p1154_p1 }
 0x178   :  { %v426_v5 = vpop.xlane.xlu1 %425  ;;  %v516_v9 = vpop.xlane.xlu0 %515  ;;  %v707_v27 = vsub.f32 %v1351_v42, %v1549_v43 }
 0x179   :  { %1087 = vrsqrt.f32 %v756_v1  ;;  %v675_v14 = vmax.f32 %v643_v4, 0.0  ;;  %v595_v15 = vmul.f32 0.010416667, %v516_v9  ;;  %v1569_v33 = vmul.f32 0.010416667, %v426_v5  ;;  %p1157_p4 = pnand %p1156_p3, %p1150_p0 }
 0x17b   :  { %v739_v16 = vadd.f32 1e-05, %v675_v14  ;;  %v659_v17 = vsub.f32 %v595_v15, %v627_v11  ;;  %v630_v14 = vmul.f32 %v1569_v33, %v1569_v33 }
 0x17c   :  { %v392_v21 = vpop.xlane.xlu1 %391  ;;  %v424_v25 = vpop.xlane.xlu0 %423 }
 0x17d   :  { %1089 = vrsqrt.f32 %v739_v16  ;;  %v691_v26 = vmax.f32 %v659_v17, 0.0  ;;  %v1559_v29 = vmul.f32 0.010416667, %v392_v21  ;;  %v1571_v54 = vmul.f32 0.010416667, %v424_v25 }
 0x17f   :  { %v1086_v41 = vpop.eup %1085  ;;  %v755_v45 = vadd.f32 1e-05, %v691_v26  ;;  %v613_v24 = vmul.f32 %v1559_v29, %v1559_v29  ;;  %v629_v15 = vmul.f32 %v1571_v54, %v1571_v54 }
 0x180   :  { %v804_v51 = vmul.f32 %v1086_v41, %v708_v31  ;;  %v490_v55 = vpop.xlane.xlu1 %489  ;;  %v488_v56 = vpop.xlane.xlu0 %487 }
 0x181   :  { %1091 = vrsqrt.f32 %v755_v45  ;;  %v582_v57 = vmul.f32 0.010416667, %v490_v55  ;;  %v581_v59 = vmul.f32 0.010416667, %v488_v56 }
 0x182   :  { %v843_v63 = vmul.f32 %v1565_v44, %v804_v51 }
 0x183   :  { %v1088_v1 = vpop.eup %1087  ;;  %v646_v4 = vsub.f32 %v582_v57, %v614_v53  ;;  %v645_v5 = vsub.f32 %v581_v59, %v613_v24 }
 0x184   :  { %v882_v9 = vadd.f32 %v1576_v36, %v843_v63  ;;  %v820_v11 = vmul.f32 %v1088_v1, %v724_v60  ;;  %v522_v16 = vpop.xlane.xlu1 %521  ;;  %v520_v17 = vpop.xlane.xlu0 %519  ;;  %v723_v1 = vsub.f32 %v1359_v48, %v1553_v61 }
 0x185   :  { %v678_v21 = vmax.f32 %v646_v4, 0.0  ;;  %v677_v25 = vmax.f32 %v645_v5, 0.0  ;;  %v598_v26 = vmul.f32 0.010416667, %v522_v16  ;;  %v597_v37 = vmul.f32 0.010416667, %v520_v17 }
 0x186   :  { %914 = vst [vmem:[#allocation2 + $0x8] sm:$0xff] %v882_v9  ;;  %v859_v31 = vmul.f32 %v1565_v44, %v820_v11 }
 0x187   :  { %v1090_v41 = vpop.eup %1089  ;;  %v742_v45 = vadd.f32 1e-05, %v678_v21  ;;  %v741_v51 = vadd.f32 1e-05, %v677_v25  ;;  %v662_v53 = vsub.f32 %v598_v26, %v630_v14  ;;  %v661_v55 = vsub.f32 %v597_v37, %v629_v15 }
 0x188   :  { %v898_v56 = vadd.f32 %v1576_v36, %v859_v31  ;;  %v803_v24 = vmul.f32 %v1090_v41, %v707_v27  ;;  %v398_v57 = vpop.xlane.xlu1 %397  ;;  %v396_v59 = vpop.xlane.xlu0 %395 }
 0x189   :  { %1093 = vrsqrt.f32 %v742_v45  ;;  %v694_v60 = vmax.f32 %v662_v53, 0.0  ;;  %v693_v63 = vmax.f32 %v661_v55, 0.0  ;;  %v1595_v16 = vmul.f32 0.010416667, %v398_v57 }
 0x18a   :  { %930 = vst [vmem:[#allocation2 + $0x88] sm:$0xff] %v898_v56  ;;  %v842_v42 = vmul.f32 %v1565_v44, %v803_v24  ;;  %1095 = vrsqrt.f32 %v741_v51  ;;  %v1597_v17 = vmul.f32 0.010416667, %v396_v59  ;;  %v710_v45 = vsub.f32 %v1364_v52, %v1557_v19 }
 0x18b   :  { %v1092_v43 = vpop.eup %1091  ;;  %v758_v4 = vadd.f32 1e-05, %v694_v60  ;;  %v757_v5 = vadd.f32 1e-05, %v693_v63  ;;  %v616_v37 = vmul.f32 %v1595_v16, %v1595_v16  ;;  %v709_v55 = vsub.f32 %v1397_v6, %v1559_v29 }
 0x18c   :  { %v881_v9 = vadd.f32 %v1576_v36, %v842_v42  ;;  %v819_v11 = vmul.f32 %v1092_v43, %v723_v1  ;;  %v430_v14 = vpop.xlane.xlu1 %429  ;;  %v428_v15 = vpop.xlane.xlu0 %427  ;;  %v615_v27 = vmul.f32 %v1597_v17, %v1597_v17  ;;  %v726_v59 = vsub.f32 %v1378_v58, %v1569_v33 }
 0x18d   :  { %1097 = vrsqrt.f32 %v758_v4  ;;  %v1601_v61 = vmul.f32 0.010416667, %v430_v14  ;;  %v1609_v51 = vmul.f32 0.010416667, %v428_v15 }
 0x18e   :  { %913 = vst [vmem:[#allocation2] sm:$0xff] %v881_v9  ;;  %v858_v21 = vmul.f32 %v1565_v44, %v819_v11  ;;  %1099 = vrsqrt.f32 %v757_v5  ;;  %v725_v5 = vsub.f32 %v1400_v7, %v1571_v54 }
 0x18f   :  { %v632_v63 = vmul.f32 %v1601_v61, %v1601_v61  ;;  %v631_v29 = vmul.f32 %v1609_v51, %v1609_v51 }
 0x190   :  { %v897_v48 = vadd.f32 %v1576_v36, %v858_v21  ;;  %v494_v25 = vpop.xlane.xlu1 %493  ;;  %v492_v26 = vpop.xlane.xlu0 %491 }
 0x191   :  { %v584_v31 = vmul.f32 0.010416667, %v494_v25  ;;  %v583_v41 = vmul.f32 0.010416667, %v492_v26 }
 0x192   :  { %929 = vst [vmem:[#allocation2 + $0x80] sm:$0xff] %v897_v48 }
 0x193   :  { %v1094_v53 = vpop.eup %1093  ;;  %v648_v56 = vsub.f32 %v584_v31, %v616_v37  ;;  %v647_v24 = vsub.f32 %v583_v41, %v615_v27 }
 0x194   :  { %v1096_v57 = vpop.eup %1095  ;;  %v806_v60 = vmul.f32 %v1094_v53, %v710_v45  ;;  %v526_v1 = vpop.xlane.xlu1 %525 }
 0x195   :  { %v524_v42 = vpop.xlane.xlu0 %523  ;;  %v805_v52 = vmul.f32 %v1096_v57, %v709_v55  ;;  %v680_v19 = vmax.f32 %v648_v56, 0.0  ;;  %v679_v43 = vmax.f32 %v647_v24, 0.0  ;;  %v600_v4 = vmul.f32 0.010416667, %v526_v1 }
 0x196   :  { %v845_v6 = vmul.f32 %v1565_v44, %v806_v60  ;;  %v599_v9 = vmul.f32 0.010416667, %v524_v42 }
 0x197   :  { %v1098_v58 = vpop.eup %1097  ;;  %v844_v33 = vmul.f32 %v1565_v44, %v805_v52  ;;  %v744_v11 = vadd.f32 1e-05, %v680_v19  ;;  %v743_v14 = vadd.f32 1e-05, %v679_v43  ;;  %v664_v15 = vsub.f32 %v600_v4, %v632_v63 }
 0x198   :  { %v1100_v21 = vpop.eup %1099  ;;  %v884_v48 = vadd.f32 %v1576_v36, %v845_v6  ;;  %v822_v25 = vmul.f32 %v1098_v58, %v726_v59  ;;  %v663_v26 = vsub.f32 %v599_v9, %v631_v29  ;;  %v402_v37 = vpop.xlane.xlu1 %401  ;;  %v712_v29 = vsub.f32 %v1449_v35, %v1595_v16 }
 0x199   :  { %v400_v27 = vpop.xlane.xlu0 %399  ;;  %v883_v7 = vadd.f32 %v1576_v36, %v844_v33  ;;  %v821_v54 = vmul.f32 %v1100_v21, %v725_v5  ;;  %1101 = vrsqrt.f32 %v744_v11  ;;  %v696_v31 = vmax.f32 %v664_v15, 0.0 }
 0x19a   :  { %916 = vst [vmem:[#allocation2 + $0x18] sm:$0xff] %v884_v48  ;;  %v861_v41 = vmul.f32 %v1565_v44, %v822_v25  ;;  %1103 = vrsqrt.f32 %v743_v14  ;;  %v695_v45 = vmax.f32 %v663_v26, 0.0  ;;  %v1629_v63 = vmul.f32 0.010416667, %v402_v37 }
 0x19b   :  { %915 = vst [vmem:[#allocation2 + $0x10] sm:$0xff] %v883_v7  ;;  %v860_v53 = vmul.f32 %v1565_v44, %v821_v54  ;;  %v760_v55 = vadd.f32 1e-05, %v696_v31  ;;  %v1631_v1 = vmul.f32 0.010416667, %v400_v27  ;;  %v711_v33 = vsub.f32 %v1452_v38, %v1597_v17 }
 0x19c   :  { %v900_v56 = vadd.f32 %v1576_v36, %v861_v41  ;;  %v759_v24 = vadd.f32 1e-05, %v695_v45  ;;  %v434_v57 = vpop.xlane.xlu1 %433  ;;  %v618_v43 = vmul.f32 %v1629_v63, %v1629_v63  ;;  %v728_v21 = vsub.f32 %v1456_v39, %v1601_v61 }
 0x19d   :  { %v432_v59 = vpop.xlane.xlu0 %431  ;;  %v899_v60 = vadd.f32 %v1576_v36, %v860_v53  ;;  %1105 = vrsqrt.f32 %v760_v55  ;;  %v1633_v42 = vmul.f32 0.010416667, %v434_v57  ;;  %v617_v4 = vmul.f32 %v1631_v1, %v1631_v1 }
 0x19e   :  { %932 = vst [vmem:[#allocation2 + $0x98] sm:$0xff] %v900_v56  ;;  %1107 = vrsqrt.f32 %v759_v24  ;;  %v1641_v9 = vmul.f32 0.010416667, %v432_v59  ;;  %v727_v54 = vsub.f32 %v1459_v40, %v1609_v51 }
 0x19f   :  { %931 = vst [vmem:[#allocation2 + $0x90] sm:$0xff] %v899_v60  ;;  %v634_v25 = vmul.f32 %v1633_v42, %v1633_v42 }
 0x1a0   :  { %v498_v52 = vpop.xlane.xlu1 %497  ;;  %v633_v17 = vmul.f32 %v1641_v9, %v1641_v9 }
 0x1a1   :  { %v496_v19 = vpop.xlane.xlu0 %495  ;;  %v586_v5 = vmul.f32 0.010416667, %v498_v52 }
 0x1a2   :  { %v585_v6 = vmul.f32 0.010416667, %v496_v19 }
 0x1a3   :  { %v1102_v58 = vpop.eup %1101  ;;  %v650_v11 = vsub.f32 %v586_v5, %v618_v43 }
 0x1a4   :  { %v649_v14 = vsub.f32 %v585_v6, %v617_v4  ;;  %v1104_v15 = vpop.eup %1103  ;;  %v808_v48 = vmul.f32 %v1102_v58, %v712_v29  ;;  %v530_v26 = vpop.xlane.xlu1 %529 }
 0x1a5   :  { %v528_v37 = vpop.xlane.xlu0 %527  ;;  %v807_v27 = vmul.f32 %v1104_v15, %v711_v33  ;;  %v682_v35 = vmax.f32 %v650_v11, 0.0  ;;  %v602_v7 = vmul.f32 0.010416667, %v530_v26 }
 0x1a6   :  { %v681_v16 = vmax.f32 %v649_v14, 0.0  ;;  %v847_v38 = vmul.f32 %v1565_v44, %v808_v48  ;;  %v601_v31 = vmul.f32 0.010416667, %v528_v37 }
 0x1a7   :  { %v1106_v39 = vpop.eup %1105  ;;  %v846_v61 = vmul.f32 %v1565_v44, %v807_v27  ;;  %v746_v41 = vadd.f32 1e-05, %v682_v35  ;;  %v666_v53 = vsub.f32 %v602_v7, %v634_v25 }
 0x1a8   :  { %v745_v45 = vadd.f32 1e-05, %v681_v16  ;;  %v1108_v55 = vpop.eup %1107  ;;  %v886_v56 = vadd.f32 %v1576_v36, %v847_v38  ;;  %v824_v24 = vmul.f32 %v1106_v39, %v728_v21  ;;  %v665_v57 = vsub.f32 %v601_v31, %v633_v17  ;;  %v406_v59 = vpop.xlane.xlu1 %405 }
 0x1a9   :  { %v404_v60 = vpop.xlane.xlu0 %403  ;;  %v885_v40 = vadd.f32 %v1576_v36, %v846_v61  ;;  %v823_v51 = vmul.f32 %v1108_v55, %v727_v54  ;;  %1109 = vrsqrt.f32 %v746_v41  ;;  %v698_v52 = vmax.f32 %v666_v53, 0.0 }
 0x1aa   :  { %918 = vst [vmem:[#allocation2 + $0x28] sm:$0xff] %v886_v56  ;;  %v863_v19 = vmul.f32 %v1565_v44, %v824_v24  ;;  %1111 = vrsqrt.f32 %v745_v45  ;;  %v697_v43 = vmax.f32 %v665_v57, 0.0  ;;  %v1661_v14 = vmul.f32 0.010416667, %v406_v59 }
 0x1ab   :  { %917 = vst [vmem:[#allocation2 + $0x20] sm:$0xff] %v885_v40  ;;  %v862_v4 = vmul.f32 %v1565_v44, %v823_v51  ;;  %v762_v5 = vadd.f32 1e-05, %v698_v52  ;;  %v1663_v15 = vmul.f32 0.010416667, %v404_v60  ;;  %v714_v16 = vsub.f32 %v1475_v46, %v1629_v63 }
 0x1ac   :  { %v902_v6 = vadd.f32 %v1576_v36, %v863_v19  ;;  %v761_v29 = vadd.f32 1e-05, %v697_v43  ;;  %v438_v58 = vpop.xlane.xlu1 %437  ;;  %v620_v26 = vmul.f32 %v1661_v14, %v1661_v14  ;;  %v713_v38 = vsub.f32 %v1479_v47, %v1631_v1 }
 0x1ad   :  { %v436_v33 = vpop.xlane.xlu0 %435  ;;  %v901_v11 = vadd.f32 %v1576_v36, %v862_v4  ;;  %1113 = vrsqrt.f32 %v762_v5  ;;  %v1665_v21 = vmul.f32 0.010416667, %v438_v58  ;;  %v619_v37 = vmul.f32 %v1663_v15, %v1663_v15 }
 0x1ae   :  { %934 = vst [vmem:[#allocation2 + $0xa8] sm:$0xff] %v902_v6  ;;  %1115 = vrsqrt.f32 %v761_v29  ;;  %v1673_v7 = vmul.f32 0.010416667, %v436_v33  ;;  %v730_v61 = vsub.f32 %v1483_v49, %v1633_v42  ;;  %v729_v57 = vsub.f32 %v1487_v50, %v1641_v9 }
 0x1af   :  { %933 = vst [vmem:[#allocation2 + $0xa0] sm:$0xff] %v901_v11  ;;  %v636_v45 = vmul.f32 %v1665_v21, %v1665_v21 }
 0x1b0   :  { %v502_v48 = vpop.xlane.xlu1 %501  ;;  %v635_v1 = vmul.f32 %v1673_v7, %v1673_v7 }
 0x1b1   :  { %v500_v25 = vpop.xlane.xlu0 %499  ;;  %v588_v27 = vmul.f32 0.010416667, %v502_v48 }
 0x1b2   :  { %v587_v35 = vmul.f32 0.010416667, %v500_v25 }
 0x1b3   :  { %v1110_v54 = vpop.eup %1109  ;;  %v652_v17 = vsub.f32 %v588_v27, %v620_v26 }
 0x1b4   :  { %v651_v31 = vsub.f32 %v587_v35, %v619_v37  ;;  %v1112_v39 = vpop.eup %1111  ;;  %v810_v41 = vmul.f32 %v1110_v54, %v714_v16  ;;  %v534_v53 = vpop.xlane.xlu1 %533 }
 0x1b5   :  { %v532_v55 = vpop.xlane.xlu0 %531  ;;  %v809_v56 = vmul.f32 %v1112_v39, %v713_v38  ;;  %v684_v46 = vmax.f32 %v652_v17, 0.0  ;;  %v604_v24 = vmul.f32 0.010416667, %v534_v53  ;;  %v716_v53 = vsub.f32 %v1384_v62, %v1661_v14 }
 0x1b6   :  { %v683_v63 = vmax.f32 %v651_v31, 0.0  ;;  %v849_v47 = vmul.f32 %v1565_v44, %v810_v41  ;;  %v603_v59 = vmul.f32 0.010416667, %v532_v55 }
 0x1b7   :  { %v1114_v49 = vpop.eup %1113  ;;  %v848_v42 = vmul.f32 %v1565_v44, %v809_v56  ;;  %v748_v60 = vadd.f32 1e-05, %v684_v46  ;;  %v668_v51 = vsub.f32 %v604_v24, %v636_v45  ;;  %v715_v46 = vsub.f32 %v1390_v2, %v1663_v15 }
 0x1b8   :  { %v747_v40 = vadd.f32 1e-05, %v683_v63  ;;  %v1116_v52 = vpop.eup %1115  ;;  %v888_v19 = vadd.f32 %v1576_v36, %v849_v47  ;;  %v826_v43 = vmul.f32 %v1114_v49, %v730_v61  ;;  %v667_v4 = vsub.f32 %v603_v59, %v635_v1  ;;  %v410_v5 = vpop.xlane.xlu1 %409 }
 0x1b9   :  { %v408_v6 = vpop.xlane.xlu0 %407  ;;  %v887_v50 = vadd.f32 %v1576_v36, %v848_v42  ;;  %v825_v9 = vmul.f32 %v1116_v52, %v729_v57  ;;  %1117 = vrsqrt.f32 %v748_v60  ;;  %v700_v29 = vmax.f32 %v668_v51, 0.0 }
 0x1ba   :  { %920 = vst [vmem:[#allocation2 + $0x38] sm:$0xff] %v888_v19  ;;  %v865_v58 = vmul.f32 %v1565_v44, %v826_v43  ;;  %1119 = vrsqrt.f32 %v747_v40  ;;  %v699_v33 = vmax.f32 %v667_v4, 0.0  ;;  %v1693_v16 = vmul.f32 0.010416667, %v410_v5 }
 0x1bb   :  { %919 = vst [vmem:[#allocation2 + $0x30] sm:$0xff] %v887_v50  ;;  %v864_v11 = vmul.f32 %v1565_v44, %v825_v9  ;;  %v764_v48 = vadd.f32 1e-05, %v700_v29  ;;  %v1695_v54 = vmul.f32 0.010416667, %v408_v6  ;;  %v732_v47 = vsub.f32 %v1387_v0, %v1665_v21 }
 0x1bc   :  { %v904_v25 = vadd.f32 %v1576_v36, %v865_v58  ;;  %v763_v26 = vadd.f32 1e-05, %v699_v33  ;;  %v442_v37 = vpop.xlane.xlu1 %441  ;;  %v622_v39 = vmul.f32 %v1693_v16, %v1693_v16  ;;  %v731_v51 = vsub.f32 %v1393_v3, %v1673_v7 }
 0x1bd   :  { %v440_v27 = vpop.xlane.xlu0 %439  ;;  %v903_v35 = vadd.f32 %v1576_v36, %v864_v11  ;;  %1121 = vrsqrt.f32 %v764_v48  ;;  %v1697_v38 = vmul.f32 0.010416667, %v442_v37  ;;  %v621_v61 = vmul.f32 %v1695_v54, %v1695_v54 }
 0x1be   :  { %936 = vst [vmem:[#allocation2 + $0xb8] sm:$0xff] %v904_v25  ;;  %1123 = vrsqrt.f32 %v763_v26  ;;  %v1705_v55 = vmul.f32 0.010416667, %v440_v27 }
 0x1bf   :  { %935 = vst [vmem:[#allocation2 + $0xb0] sm:$0xff] %v903_v35  ;;  %v638_v59 = vmul.f32 %v1697_v38, %v1697_v38 }
 0x1c0   :  { %v506_v17 = vpop.xlane.xlu1 %505  ;;  %v637_v15 = vmul.f32 %v1705_v55, %v1705_v55 }
 0x1c1   :  { %v504_v31 = vpop.xlane.xlu0 %503  ;;  %v590_v41 = vmul.f32 0.010416667, %v506_v17 }
 0x1c2   :  { %v589_v45 = vmul.f32 0.010416667, %v504_v31 }
 0x1c3   :  { %v1118_v56 = vpop.eup %1117  ;;  %v654_v63 = vsub.f32 %v590_v41, %v622_v39 }
 0x1c4   :  { %v653_v24 = vsub.f32 %v589_v45, %v621_v61  ;;  %v1120_v57 = vpop.eup %1119  ;;  %v812_v1 = vmul.f32 %v1118_v56, %v716_v53  ;;  %v538_v49 = vpop.xlane.xlu1 %537 }
 0x1c5   :  { %v536_v42 = vpop.xlane.xlu0 %535  ;;  %v811_v60 = vmul.f32 %v1120_v57, %v715_v46  ;;  %v686_v62 = vmax.f32 %v654_v63, 0.0  ;;  %v606_v40 = vmul.f32 0.010416667, %v538_v49  ;;  %v718_v57 = vsub.f32 %v1403_v8, %v1693_v16 }
 0x1c6   :  { %v685_v14 = vmax.f32 %v653_v24, 0.0  ;;  %v851_v2 = vmul.f32 %v1565_v44, %v812_v1  ;;  %v605_v52 = vmul.f32 0.010416667, %v536_v42 }
 0x1c7   :  { %v1122_v0 = vpop.eup %1121  ;;  %v850_v21 = vmul.f32 %v1565_v44, %v811_v60  ;;  %v750_v19 = vadd.f32 1e-05, %v686_v62  ;;  %v670_v4 = vsub.f32 %v606_v40, %v638_v59  ;;  %v717_v59 = vsub.f32 %v1409_v12, %v1695_v54 }
 0x1c8   :  { %v749_v43 = vadd.f32 1e-05, %v685_v14  ;;  %v1124_v5 = vpop.eup %1123  ;;  %v890_v6 = vadd.f32 %v1576_v36, %v851_v2  ;;  %v828_v50 = vmul.f32 %v1122_v0, %v732_v47  ;;  %v669_v9 = vsub.f32 %v605_v52, %v637_v15  ;;  %v414_v29 = vpop.xlane.xlu1 %413 }
 0x1c9   :  { %v412_v58 = vpop.xlane.xlu0 %411  ;;  %v889_v3 = vadd.f32 %v1576_v36, %v850_v21  ;;  %v827_v7 = vmul.f32 %v1124_v5, %v731_v51  ;;  %1125 = vrsqrt.f32 %v750_v19  ;;  %v702_v33 = vmax.f32 %v670_v4, 0.0 }
 0x1ca   :  { %922 = vst [vmem:[#allocation2 + $0x48] sm:$0xff] %v890_v6  ;;  %v867_v11 = vmul.f32 %v1565_v44, %v828_v50  ;;  %1127 = vrsqrt.f32 %v749_v43  ;;  %v701_v48 = vmax.f32 %v669_v9, 0.0  ;;  %v1725_v39 = vmul.f32 0.010416667, %v414_v29 }
 0x1cb   :  { %921 = vst [vmem:[#allocation2 + $0x40] sm:$0xff] %v889_v3  ;;  %v866_v25 = vmul.f32 %v1565_v44, %v827_v7  ;;  %v766_v26 = vadd.f32 1e-05, %v702_v33  ;;  %v1727_v61 = vmul.f32 0.010416667, %v412_v58  ;;  %v734_v62 = vsub.f32 %v1406_v10, %v1697_v38 }
 0x1cc   :  { %v906_v37 = vadd.f32 %v1576_v36, %v867_v11  ;;  %v765_v27 = vadd.f32 1e-05, %v701_v48  ;;  %v446_v35 = vpop.xlane.xlu1 %445  ;;  %v624_v56 = vmul.f32 %v1725_v39, %v1725_v39  ;;  %v733_v0 = vsub.f32 %v1412_v13, %v1705_v55 }
 0x1cd   :  { %v444_v17 = vpop.xlane.xlu0 %443  ;;  %v905_v31 = vadd.f32 %v1576_v36, %v866_v25  ;;  %1129 = vrsqrt.f32 %v766_v26  ;;  %v1729_v41 = vmul.f32 0.010416667, %v446_v35  ;;  %v623_v46 = vmul.f32 %v1727_v61, %v1727_v61 }
 0x1ce   :  { %938 = vst [vmem:[#allocation2 + $0xc8] sm:$0xff] %v906_v37  ;;  %1131 = vrsqrt.f32 %v765_v27  ;;  %v1737_v47 = vmul.f32 0.010416667, %v444_v17 }
 0x1cf   :  { %937 = vst [vmem:[#allocation2 + $0xc0] sm:$0xff] %v905_v31  ;;  %v640_v40 = vmul.f32 %v1729_v41, %v1729_v41 }
 0x1d0   :  { %v510_v45 = vpop.xlane.xlu1 %509  ;;  %v639_v54 = vmul.f32 %v1737_v47, %v1737_v47 }
 0x1d1   :  { %v508_v53 = vpop.xlane.xlu0 %507  ;;  %v592_v63 = vmul.f32 0.010416667, %v510_v45 }
 0x1d2   :  { %v591_v24 = vmul.f32 0.010416667, %v508_v53 }
 0x1d3   :  { %v1126_v1 = vpop.eup %1125  ;;  %v656_v49 = vsub.f32 %v592_v63, %v624_v56 }
 0x1d4   :  { %v655_v42 = vsub.f32 %v591_v24, %v623_v46  ;;  %v1128_v60 = vpop.eup %1127  ;;  %v814_v14 = vmul.f32 %v1126_v1, %v718_v57  ;;  %v542_v51 = vpop.xlane.xlu1 %541  ;;  %v720_v1 = vsub.f32 %v1421_v18, %v1725_v39 }
 0x1d5   :  { %v540_v2 = vpop.xlane.xlu0 %539  ;;  %v813_v15 = vmul.f32 %v1128_v60, %v717_v59  ;;  %v688_v8 = vmax.f32 %v656_v49, 0.0  ;;  %v608_v52 = vmul.f32 0.010416667, %v542_v51 }
 0x1d6   :  { %v687_v16 = vmax.f32 %v655_v42, 0.0  ;;  %v853_v12 = vmul.f32 %v1565_v44, %v814_v14  ;;  %v607_v21 = vmul.f32 0.010416667, %v540_v2  ;;  %v719_v42 = vsub.f32 %v1427_v22, %v1727_v61 }
 0x1d7   :  { %v1130_v10 = vpop.eup %1129  ;;  %v852_v38 = vmul.f32 %v1565_v44, %v813_v15  ;;  %v752_v19 = vadd.f32 1e-05, %v688_v8  ;;  %v672_v4 = vsub.f32 %v608_v52, %v640_v40  ;;  %v736_v40 = vsub.f32 %v1424_v20, %v1729_v41 }
 0x1d8   :  { %v751_v43 = vadd.f32 1e-05, %v687_v16  ;;  %v1132_v5 = vpop.eup %1131  ;;  %v892_v6 = vadd.f32 %v1576_v36, %v853_v12  ;;  %v830_v50 = vmul.f32 %v1130_v10, %v734_v62  ;;  %v671_v9 = vsub.f32 %v607_v21, %v639_v54  ;;  %v418_v29 = vpop.xlane.xlu1 %417 }
 0x1d9   :  { %v416_v58 = vpop.xlane.xlu0 %415  ;;  %v891_v13 = vadd.f32 %v1576_v36, %v852_v38  ;;  %v829_v55 = vmul.f32 %v1132_v5, %v733_v0  ;;  %1133 = vrsqrt.f32 %v752_v19  ;;  %v704_v3 = vmax.f32 %v672_v4, 0.0 }
 0x1da   :  { %924 = vst [vmem:[#allocation2 + $0x58] sm:$0xff] %v892_v6  ;;  %v869_v7 = vmul.f32 %v1565_v44, %v830_v50  ;;  %1135 = vrsqrt.f32 %v751_v43  ;;  %v703_v33 = vmax.f32 %v671_v9, 0.0  ;;  %v1757_v17 = vmul.f32 0.010416667, %v418_v29 }
 0x1db   :  { %923 = vst [vmem:[#allocation2 + $0x50] sm:$0xff] %v891_v13  ;;  %v868_v11 = vmul.f32 %v1565_v44, %v829_v55  ;;  %v768_v48 = vadd.f32 1e-05, %v704_v3  ;;  %v1759_v31 = vmul.f32 0.010416667, %v416_v58  ;;  %v735_v0 = vsub.f32 %v1430_v23, %v1737_v47 }
 0x1dc   :  { %v908_v25 = vadd.f32 %v1576_v36, %v869_v7  ;;  %v767_v26 = vadd.f32 1e-05, %v703_v33  ;;  %v450_v37 = vpop.xlane.xlu1 %449  ;;  %v626_v46 = vmul.f32 %v1757_v17, %v1757_v17  ;;  %v722_v3 = vsub.f32 %v1437_v28, %v1757_v17 }
 0x1dd   :  { %v448_v27 = vpop.xlane.xlu0 %447  ;;  %v907_v35 = vadd.f32 %v1576_v36, %v868_v11  ;;  %1137 = vrsqrt.f32 %v768_v48  ;;  %v1761_v45 = vmul.f32 0.010416667, %v450_v37  ;;  %v625_v63 = vmul.f32 %v1759_v31, %v1759_v31 }
 0x1de   :  { %940 = vst [vmem:[#allocation2 + $0xd8] sm:$0xff] %v908_v25  ;;  %1139 = vrsqrt.f32 %v767_v26  ;;  %v577_v59 = vmul.f32 0.010416667, %v448_v27  ;;  %v721_v33 = vsub.f32 %v1443_v32, %v1759_v31 }
 0x1df   :  { %939 = vst [vmem:[#allocation2 + $0xd0] sm:$0xff] %v907_v35  ;;  %v642_v2 = vmul.f32 %v1761_v45, %v1761_v45  ;;  %v738_v26 = vsub.f32 %v1440_v30, %v1761_v45 }
 0x1e0   :  { %v514_v53 = vpop.xlane.xlu1 %513  ;;  %v641_v61 = vmul.f32 %v577_v59, %v577_v59  ;;  %v737_v35 = vsub.f32 %v1446_v34, %v577_v59 }
 0x1e1   :  { %v512_v56 = vpop.xlane.xlu0 %511  ;;  %v594_v24 = vmul.f32 0.010416667, %v514_v53 }
 0x1e2   :  { %v593_v57 = vmul.f32 0.010416667, %v512_v56 }
 0x1e3   :  { %v1134_v49 = vpop.eup %1133  ;;  %v658_v60 = vsub.f32 %v594_v24, %v626_v46 }
 0x1e4   :  { %v657_v62 = vsub.f32 %v593_v57, %v625_v63  ;;  %v1136_v14 = vpop.eup %1135  ;;  %v816_v51 = vmul.f32 %v1134_v49, %v720_v1  ;;  %v546_v15 = vpop.xlane.xlu1 %545 }
 0x1e5   :  { %v544_v8 = vpop.xlane.xlu0 %543  ;;  %v815_v16 = vmul.f32 %v1136_v14, %v719_v42  ;;  %v690_v52 = vmax.f32 %v658_v60, 0.0  ;;  %v610_v39 = vmul.f32 0.010416667, %v546_v15 }
 0x1e6   :  { %v689_v18 = vmax.f32 %v657_v62, 0.0  ;;  %v855_v22 = vmul.f32 %v1565_v44, %v816_v51  ;;  %v609_v12 = vmul.f32 0.010416667, %v544_v8 }
 0x1e7   :  { %v1138_v54 = vpop.eup %1137  ;;  %v854_v20 = vmul.f32 %v1565_v44, %v815_v16  ;;  %v754_v41 = vadd.f32 1e-05, %v690_v52  ;;  %v674_v10 = vsub.f32 %v610_v39, %v642_v2 }
 0x1e8   :  { %v753_v21 = vadd.f32 1e-05, %v689_v18  ;;  %v1140_v38 = vpop.eup %1139  ;;  %v894_v19 = vadd.f32 %v1576_v36, %v855_v22  ;;  %v832_v43 = vmul.f32 %v1138_v54, %v736_v40  ;;  %v673_v4 = vsub.f32 %v609_v12, %v641_v61 }
 0x1e9   :  { %v893_v5 = vadd.f32 %v1576_v36, %v854_v20  ;;  %v831_v6 = vmul.f32 %v1140_v38, %v735_v0  ;;  %1141 = vrsqrt.f32 %v754_v41  ;;  %v706_v23 = vmax.f32 %v674_v10, 0.0 }
 0x1ea   :  { %926 = vst [vmem:[#allocation2 + $0x68] sm:$0xff] %v894_v19  ;;  %v871_v47 = vmul.f32 %v1565_v44, %v832_v43  ;;  %1143 = vrsqrt.f32 %v753_v21  ;;  %v705_v50 = vmax.f32 %v673_v4, 0.0 }
 0x1eb   :  { %925 = vst [vmem:[#allocation2 + $0x60] sm:$0xff] %v893_v5  ;;  %v870_v9 = vmul.f32 %v1565_v44, %v831_v6  ;;  %v770_v29 = vadd.f32 1e-05, %v706_v23 }
 0x1ec   :  { %v910_v58 = vadd.f32 %v1576_v36, %v871_v47  ;;  %v769_v13 = vadd.f32 1e-05, %v705_v50 }
 0x1ed   :  { %v909_v55 = vadd.f32 %v1576_v36, %v870_v9  ;;  %1145 = vrsqrt.f32 %v770_v29 }
 0x1ee   :  { %942 = vst [vmem:[#allocation2 + $0xe8] sm:$0xff] %v910_v58  ;;  %1147 = vrsqrt.f32 %v769_v13 }
 0x1ef   :  { %941 = vst [vmem:[#allocation2 + $0xe0] sm:$0xff] %v909_v55 }
 0x1f3   :  { %v1142_v7 = vpop.eup %1141 }
 0x1f4   :  { %v1144_v11 = vpop.eup %1143  ;;  %v818_v48 = vmul.f32 %v1142_v7, %v722_v3 }
 0x1f5   :  { %v817_v25 = vmul.f32 %v1144_v11, %v721_v33 }
 0x1f6   :  { %v857_v37 = vmul.f32 %v1565_v44, %v818_v48 }
 0x1f7   :  { %v1146_v27 = vpop.eup %1145  ;;  %v856_v53 = vmul.f32 %v1565_v44, %v817_v25 }
 0x1f8   :  { %v1148_v56 = vpop.eup %1147  ;;  %v896_v28 = vadd.f32 %v1576_v36, %v857_v37  ;;  %v834_v17 = vmul.f32 %v1146_v27, %v738_v26 }
 0x1f9   :  { %v895_v46 = vadd.f32 %v1576_v36, %v856_v53  ;;  %v833_v32 = vmul.f32 %v1148_v56, %v737_v35 }
 0x1fa   :  { %928 = vst [vmem:[#allocation2 + $0x78] sm:$0xff] %v896_v28  ;;  %v873_v31 = vmul.f32 %v1565_v44, %v834_v17 }
 0x1fb   :  { %927 = vst [vmem:[#allocation2 + $0x70] sm:$0xff] %v895_v46  ;;  %v872_v30 = vmul.f32 %v1565_v44, %v833_v32 }
 0x1fc   :  { %v912_v45 = vadd.f32 %v1576_v36, %v873_v31 }
 0x1fd   :  { %v911_v34 = vadd.f32 %v1576_v36, %v872_v30 }
 0x1fe   :  { %944 = vst [vmem:[#allocation2 + $0xf8] sm:$0xff] %v912_v45 }
 0x1ff   :  { %943 = vst [vmem:[#allocation2 + $0xf0] sm:$0xff] %v911_v34 }
 0x200   :  { %1160 = shalt.err (!%p1157_p4)
}
 0x201   :  { %s1161_s13 = scalar_lea.hbm %s1817_s5, 4096 }
 0x202   :  { %p1162_p5 = scmp.ne.s32.totalorder %s1817_s5, %s1161_s13  ;;  %p1165_p6 = scmp.lt.u32.totalorder %s1161_s13, %s1817_s5 }
 0x204   :  { %p1167_p7 = pnand %p1165_p6, %p1162_p5 }
 0x206   :  { %1170 = shalt.err (!%p1167_p7)
}
 0x207   :  { %s1174_s18 = smov 128   ;;  %s1175_s19 = smov 8  }
 0x208   :  { %956 = dma.vmem_to_hbm [thread:$0]  %s951_s4, 4096, %s1817_s5, [#allocation3], %s1174_s18, %s1174_s18, %s1175_s19  }
 0x209   :  { %1171 = dma.done.wait [#allocation3], 4096  }
 0x20a   :  { %1172 = vsyncadd [#allocation3], 4294963200 }
 0x20b   :  { %960 = vsyncpa [#allocation3], 1 }

</bundles_post_ra>
